<compile_context>
chip_gen: v6e
topology: v6e:2x2x1
jax: 0.10.0
libtpu: 0.0.40
codegen_flags: <defaults>
</compile_context>

<pallas_src>
import functools
import math

import jax
import jax.numpy as jnp
from jax.experimental import pallas as pl
from jax.experimental.pallas import tpu as pltpu

_HALF_PI = math.pi / 2.0
_VMEM_LIMIT_BYTES = 32 * 1024 * 1024  # safe on v5e/v6e (128 MiB phys) and v7x (64 MiB phys)


def _round_up(x, m):
    return ((x + m - 1) // m) * m


def _fused_tables(shape, dim, nk):
    """freq/phase along `dim` of `shape`: lane/sublane j carries
       freq = j+1, phase = 0       for j < nk   (sin branch)
       freq = j-nk+1, phase = pi/2 otherwise    (cos via sin(x + pi/2))."""
    idx = jax.lax.broadcasted_iota(jnp.int32, shape, dim)
    idx_f = idx.astype(jnp.float32)
    is_sin = idx < nk
    freq = jnp.where(is_sin, idx_f + 1.0, idx_f - jnp.float32(nk - 1))
    phase = jnp.where(is_sin, jnp.float32(0.0), jnp.float32(_HALF_PI))
    return freq, phase


def _rows_kernel(angle_ref, out_ref, *, nk, num_basis):
    # angle_ref : (tn, 1) f32 ; out_ref : (tn, num_basis)  (PyTorch layout)
    ang = angle_ref[...]
    freq, phase = _fused_tables((1, num_basis), 1, nk)
    out_ref[...] = jnp.sin(ang * freq + phase).astype(out_ref.dtype)


def _lanes_kernel(angle_ref, out_ref, *, nk, num_basis):
    # angle_ref : (1, tn) f32 ; out_ref : (num_basis, tn)  (lane-dense layout)
    ang = angle_ref[...]
    freq, phase = _fused_tables((num_basis, 1), 0, nk)
    out_ref[...] = jnp.sin(freq * ang + phase).astype(out_ref.dtype)


def asymmetric_sine_cosine_smearing(angle, num_basis=50, *, tile_n=None,
                                    transposed_output=False,
                                    out_dtype=jnp.float32):
    """AsymmetricSineCosineSmearing.forward.

    angle : any-shape float array (assumed bounded, e.g. bond angles in [0, pi]).
    Returns (angle.size, num_basis) by default (matches the PyTorch module), or
    (num_basis, angle.size) lane-dense when transposed_output=True.
    """
    num_basis_k = num_basis // 2

    angle_flat = jnp.reshape(angle, (-1,)).astype(jnp.float32)
    n = int(angle_flat.shape[0])

    if transposed_output:
        align = 128                          # lane granularity (last dim)
        tn = tile_n if tile_n is not None else 16384
    else:
        align = 8                            # sublane granularity (2nd-to-last dim)
        tn = tile_n if tile_n is not None else 8192

    # Largest tile that does not exceed the (aligned) problem size.
    tn = max(align, _round_up(min(tn, max(n, 1)), align))
    # For large inputs keep >= 2 grid steps so v7x megacore has work for both TCs.
    if n >= 4096:
        tn = min(tn, _round_up(pl.cdiv(n, 2), align))
    grid = (pl.cdiv(n, tn),)

    cparams = pltpu.CompilerParams(
        dimension_semantics=("parallel",),
        vmem_limit_bytes=_VMEM_LIMIT_BYTES,
    )

    if transposed_output:
        kernel = functools.partial(_lanes_kernel, nk=num_basis_k,
                                   num_basis=num_basis)
        return pl.pallas_call(
            kernel,
            out_shape=jax.ShapeDtypeStruct((num_basis, n), out_dtype),
            grid=grid,
            in_specs=[pl.BlockSpec((1, tn), lambda i: (0, i))],
            out_specs=pl.BlockSpec((num_basis, tn), lambda i: (0, i)),
            compiler_params=cparams,
        )(angle_flat[None, :])

    kernel = functools.partial(_rows_kernel, nk=num_basis_k,
                               num_basis=num_basis)
    return pl.pallas_call(
        kernel,
        out_shape=jax.ShapeDtypeStruct((n, num_basis), out_dtype),
        grid=grid,
        in_specs=[pl.BlockSpec((tn, 1), lambda i: (i, 0))],
        out_specs=pl.BlockSpec((tn, num_basis), lambda i: (i, 0)),
        compiler_params=cparams,
    )(angle_flat[:, None])


def _reference(angle, num_basis=50):
    num_basis_k = num_basis // 2
    num_basis_l = num_basis - num_basis_k
    freq_k = jnp.arange(1, num_basis_k + 1, dtype=jnp.float32)
    freq_l = jnp.arange(1, num_basis_l + 1, dtype=jnp.float32)
    a = jnp.reshape(angle, (-1, 1)).astype(jnp.float32)
    return jnp.concatenate(
        [jnp.sin(a * freq_k[None, :]), jnp.cos(a * freq_l[None, :])], axis=-1)


if __name__ == "__main__":
    key = jax.random.PRNGKey(0)
    # angles in [0, pi] — e.g. 16 bond angles from a small molecular graph
    angle = jax.random.uniform(key, (16,), dtype=jnp.float32,
                               minval=0.0, maxval=math.pi)

    ref = _reference(angle, num_basis=50)

    # Default layout: matches the PyTorch module, (N, num_basis).
    out = asymmetric_sine_cosine_smearing(angle, num_basis=50)
    out = jax.block_until_ready(out)
    assert out.shape == (16, 50), out.shape
    assert jnp.allclose(out, ref, atol=2e-4, rtol=2e-4), \
        float(jnp.max(jnp.abs(out - ref)))

    # Lane-dense transposed layout (fusion-friendly consumers / v7x roofline).
    out_t = asymmetric_sine_cosine_smearing(angle, num_basis=50,
                                            transposed_output=True)
    out_t = jax.block_until_ready(out_t)
    assert out_t.shape == (50, 16), out_t.shape
    assert jnp.allclose(out_t, ref.T, atol=2e-4, rtol=2e-4), \
        float(jnp.max(jnp.abs(out_t - ref.T)))

    print("KERNEL_OK")
</pallas_src>

<mosaic_0001>
module attributes {stable_mosaic.version = 11 : i64} {
  func.func @_rows_kernel(%arg0: i32, %arg1: memref<16x1xf32, #tpu.memory_space<vmem>>, %arg2: memref<16x50xf32, #tpu.memory_space<vmem>>) attributes {dimension_semantics = [#tpu.dimension_semantics<parallel>], iteration_bounds = array<i64: 1>, scalar_prefetch = 0 : i64, scratch_operands = 0 : i64, tpu.core_type = #tpu.core_type<tc>, window_params = [{transform_indices = @transform_0, window_bounds = array<i64: 16, 1>}, {transform_indices = @transform_1, window_bounds = array<i64: 16, 50>}]} {
    %c0 = arith.constant 0 : index
    %c0_0 = arith.constant 0 : index
    %0 = vector.load %arg1[%c0, %c0_0] : memref<16x1xf32, #tpu.memory_space<vmem>>, vector<16x1xf32>
    %1 = tpu.iota {dimensions = array<i32: 1>} : vector<1x50xi32>
    %2 = arith.sitofp %1 : vector<1x50xi32> to vector<1x50xf32>
    %c25_i32 = arith.constant 25 : i32
    %3 = vector.broadcast %c25_i32 : i32 to vector<1x50xi32>
    %4 = arith.cmpi slt, %1, %3 : vector<1x50xi32>
    %cst = arith.constant 1.000000e+00 : f32
    %5 = vector.broadcast %cst : f32 to vector<1x50xf32>
    %6 = arith.addf %2, %5 : vector<1x50xf32>
    %cst_1 = arith.constant 2.400000e+01 : f32
    %7 = vector.broadcast %cst_1 : f32 to vector<1x50xf32>
    %8 = arith.subf %2, %7 : vector<1x50xf32>
    %9 = arith.select %4, %6, %8 : vector<1x50xi1>, vector<1x50xf32>
    %cst_2 = arith.constant 0.000000e+00 : f32
    %cst_3 = arith.constant 1.57079637 : f32
    %10 = vector.broadcast %cst_2 : f32 to vector<1x50xf32>
    %11 = vector.broadcast %cst_3 : f32 to vector<1x50xf32>
    %12 = arith.select %4, %10, %11 : vector<1x50xi1>, vector<1x50xf32>
    %13 = vector.broadcast %0 : vector<16x1xf32> to vector<16x50xf32>
    %14 = vector.broadcast %9 : vector<1x50xf32> to vector<16x50xf32>
    %15 = arith.mulf %13, %14 : vector<16x50xf32>
    %16 = vector.broadcast %12 : vector<1x50xf32> to vector<16x50xf32>
    %17 = arith.addf %15, %16 : vector<16x50xf32>
    %18 = math.sin %17 : vector<16x50xf32>
    %c0_4 = arith.constant 0 : index
    %c0_5 = arith.constant 0 : index
    %19 = vector.load %arg2[%c0_4, %c0_5] : memref<16x50xf32, #tpu.memory_space<vmem>>, vector<16x50xf32>
    tpu.vector_store %arg2[%c0_4, %c0_5], %18 {strides = array<i32>} : memref<16x50xf32, #tpu.memory_space<vmem>>, vector<16x50xf32>,
    return
  }
  func.func @transform_0(%arg0: i32) -> (i32, i32) {
    %c0_i32 = arith.constant 0 : i32
    %c0_i32_0 = arith.constant 0 : i32
    return %arg0, %c0_i32 : i32, i32
  }
  func.func @transform_1(%arg0: i32) -> (i32, i32) {
    %c0_i32 = arith.constant 0 : i32
    %c0_i32_0 = arith.constant 0 : i32
    return %arg0, %c0_i32 : i32, i32
  }
}

</mosaic_0001>

<bundles_post_ra>
// kernel: tpu_custom_call.1
= control target key start
LH: loop header
LB: loop body
LE: loop exit
PB: predicated region body
PF: predicated region fallthrough
CT: control target
= control target key end

     0   :  { %v319_v1 = vmov 0   ;;  %s419_s0 = inlined_call_operand.vmem [shape: f32[16,1], index: 0, kind: input, shape index: {}]   ;;  %s420_s1 = inlined_call_operand.hbm [shape: f32[16,50], index: 1, kind: output, shape index: {}]  }
   0x1   :  { %v9_v0 = vld [vmem:[%s419_s0] sm:$0xff]  ;;  %288 = vset.pattern.permute.xlu0 %v319_v1  ;;  %v10_v2 = vld [vmem:[%s419_s0 + $0x8] sm:$0xff] }
   0x2   :  { %21 = vperm.xlu0 %288, %v9_v0  }
   0x3   :  { %6 = vsyncpa [#allocation3], 0  ;;  %v11_v3 = vlaneseq  ;;  %v320_v9 = vmov 1.5707964   ;;  %v321_v33 = vmov 683565275  }
   0x4   :  { %v322_v37 = vmov 2475754826   ;;  %v323_v39 = vmov 2131351028   ;;  %v324_v41 = vmov 2102212464  }
   0x5   :  { %v12_v4 = vand.u32 127, %v11_v3  ;;  %v325_v43 = vmov 920167782   ;;  %v326_v50 = vmov 1326507024   ;;  %s327_s0 = smov [#allocation2]  }
   0x6   :  { %26 = vperm.xlu0 %288, %v10_v2   ;;  %s249_s10 = sshll.u32 %s327_s0, 4  ;;  %s250_s10 = int_to_ptr.vmem [resolvable:$true] %s249_s10 }
   0x7   :  { %v13_v5 = vcvt.s32.f32 %v12_v4  ;;  %vm14_vm0 = vcmp.lt.s32.totalorder %v12_v4, 25  ;;  %s297_s11 = scalar_lea.vmem %s250_s10, 256  ;;  %p302_p1 = scmp.lt.s32.totalorder %s250_s10, %s250_s10 }
   0x8   :  { %v18_v10 = vsel %vm14_vm0, 0.0, %v320_v9  ;;  %p298_p0 = scmp.ne.s32.totalorder %s250_s10, %s297_s11  ;;  %p303_p2 = scmp.lt.s32.totalorder %s297_s11, %s297_s11 }
   0x9   :  { %v15_v6 = vadd.f32 1.0, %v13_v5  ;;  %v260_v7 = vadd.f32 -24.0, %v13_v5 }
   0xa   :  { %p304_p3 = por %p303_p2, %p302_p1 }
   0xb   :  { %v17_v8 = vsel %vm14_vm0, %v15_v6, %v260_v7 }
   0xc   :  { %p305_p4 = pnand %p304_p3, %p298_p0 }
  0x7d   :  { %v22_v11 = vpop.permute.xlu0 %21 }
  0x7e   :  { %v29_v12 = vmul.f32 %v22_v11, %v17_v8 }
  0x80   :  { %v346_v13 = vadd.f32 %v29_v12, %v18_v10 }
  0x81   :  { %v27_v14 = vpop.permute.xlu0 %26 }
  0x82   :  { %v33_v15 = vand.u32 2147483647, %v346_v13  ;;  %v36_v16 = vand.u32 2139095040, %v346_v13  ;;  %v30_v17 = vmul.f32 %v27_v14, %v17_v8  ;;  %vm35_vm15 = vcmp.lt.s32.totalorder %v346_v13, 0 }
  0x84   :  { %v37_v18 = vshrl.u32 %v36_v16, 23  ;;  %v350_v19 = vadd.f32 %v30_v17, %v18_v10  ;;  %v40_v20 = vand.u32 8388607, %v33_v15  ;;  %vm34_vm0 = vcmp.le.f32.partialorder %v33_v15, 0.7853982 }
  0x86   :  { %v261_v21 = vadd.s32 4294967169, %v37_v18  ;;  %v140_v22 = vand.u32 2139095040, %v350_v19  ;;  %v41_v24 = vor.u32 8388608, %v40_v20  ;;  %v137_v26 = vand.u32 2147483647, %v350_v19 }
  0x88   :  { %v43_v23 = vadd.s32 1, %v261_v21  ;;  %v141_v25 = vshrl.u32 %v140_v22, 23  ;;  %v356_v31 = vshll.u32 %v41_v24, 8  ;;  %v144_v35 = vand.u32 8388607, %v137_v26 }
  0x8a   :  { %vm44_vm1 = vcmp.gt.s32.totalorder %v43_v23, 0  ;;  %v265_v28 = vadd.s32 4294967169, %v141_v25  ;;  %v145_v1 = vor.u32 8388608, %v144_v35 }
  0x8b   :  { %v45_v27 = vsel %vm44_vm1, %v43_v23, 0  ;;  %vm139_vm1 = vcmp.lt.s32.totalorder %v350_v19, 0 }
  0x8c   :  { %v46_v29 = vshrl.u32 %v45_v27, 5  ;;  %v47_v30 = vand.u32 31, %v45_v27  ;;  %v147_v36 = vadd.s32 1, %v265_v28  ;;  %v185_v16 = vshll.u32 %v145_v1, 8 }
  0x8e   :  { %v48_v32 = vsub.s32 32, %v47_v30  ;;  %v50_v34 = vshll.u32 %v321_v33, %v47_v30  ;;  %v53_v38 = vshll.u32 %v322_v37, %v47_v30  ;;  %v56_v40 = vshll.u32 %v323_v39, %v47_v30 }
  0x8f   :  { %v59_v42 = vshll.u32 %v324_v41, %v47_v30  ;;  %v62_v44 = vshll.u32 %v325_v43, %v47_v30  ;;  %vm65_vm2 = vcmp.lt.s32.totalorder %v46_v29, 1  ;;  %vm67_vm3 = vcmp.lt.s32.totalorder %v46_v29, 3 }
  0x90   :  { %v51_v45 = vshrl.u32 %v322_v37, %v48_v32  ;;  %v54_v46 = vshrl.u32 %v323_v39, %v48_v32  ;;  %v57_v47 = vshrl.u32 %v324_v41, %v48_v32  ;;  %v49_v48 = vshrl.u32 %v321_v33, %v48_v32 }
  0x91   :  { %v60_v49 = vshrl.u32 %v325_v43, %v48_v32  ;;  %v63_v51 = vshrl.u32 %v326_v50, %v48_v32  ;;  %vm148_vm4 = vcmp.gt.s32.totalorder %v147_v36, 0  ;;  %vm68_vm5 = vcmp.lt.s32.totalorder %v46_v29, 4 }
  0x92   :  { %v52_v52 = vor.u32 %v51_v45, %v50_v34  ;;  %v55_v53 = vor.u32 %v54_v46, %v53_v38  ;;  %v58_v54 = vor.u32 %v57_v47, %v56_v40  ;;  %v149_v57 = vsel %vm148_vm4, %v147_v36, 0 }
  0x93   :  { %v61_v55 = vor.u32 %v60_v49, %v59_v42  ;;  %v64_v56 = vor.u32 %v63_v51, %v62_v44  ;;  %vm66_vm6 = vcmp.lt.s32.totalorder %v46_v29, 2  ;;  %v151_v4 = vand.u32 31, %v149_v57 }
  0x94   :  { %v69_v58 = vsel %vm65_vm2, %v49_v48, %v52_v52  ;;  %v70_v59 = vsel %vm68_vm5, %v58_v54, 2102212464  ;;  %v73_v60 = vsel %vm65_vm2, %v52_v52, %v55_v53  ;;  %v77_v61 = vsel %vm65_vm2, %v55_v53, %v58_v54 }
  0x95   :  { %v71_v62 = vsel %vm67_vm3, %v55_v53, %v70_v59  ;;  %v74_v63 = vsel %vm68_vm5, %v61_v55, 920167782  ;;  %v78_v0 = vsel %vm68_vm5, %v64_v56, 1326507024  ;;  %v150_v12 = vshrl.u32 %v149_v57, 5 }
  0x96   :  { %v75_v2 = vsel %vm67_vm3, %v58_v54, %v74_v63  ;;  %v79_v3 = vsel %vm67_vm3, %v61_v55, %v78_v0  ;;  %v72_v5 = vsel %vm66_vm6, %v69_v58, %v71_v62  ;;  %v152_v14 = vsub.s32 32, %v151_v4 }
  0x97   :  { %v76_v6 = vsel %vm66_vm6, %v73_v60, %v75_v2  ;;  %v80_v7 = vsel %vm66_vm6, %v77_v61, %v79_v3  ;;  %v88_v17 = vmul.u32 %v356_v31, %v72_v5  ;;  %v154_v18 = vshll.u32 %v321_v33, %v151_v4 }
  0x98   :  { %v369_v8 = vmul.u32.u64.low %v356_v31, %v80_v7  ;;  %v370_v9 = vmul.u32.u64.high %v356_v31, %v80_v7, %v369_v8  ;;  %v373_v10 = vmul.u32.u64.low %v356_v31, %v76_v6  ;;  %v374_v11 = vmul.u32.u64.high %v356_v31, %v76_v6, %v373_v10 }
  0x99   :  { %v157_v20 = vshll.u32 %v322_v37, %v151_v4  ;;  %v160_v21 = vshll.u32 %v323_v39, %v151_v4  ;;  %v155_v22 = vshrl.u32 %v322_v37, %v152_v14  ;;  %v158_v23 = vshrl.u32 %v323_v39, %v152_v14 }
  0x9a   :  { %v161_v24 = vshrl.u32 %v324_v41, %v152_v14  ;;  %v163_v25 = vshll.u32 %v324_v41, %v151_v4  ;;  %vm90_vm7 = vc.u32 %v370_v9, %v373_v10  ;;  %v91_v27 = vadd.s32 1, %v374_v11 }
  0x9b   :  { %v164_v28 = vshrl.u32 %v325_v43, %v152_v14  ;;  %v166_v29 = vshll.u32 %v325_v43, %v151_v4  ;;  %v156_v30 = vor.u32 %v155_v22, %v154_v18  ;;  %v159_v32 = vor.u32 %v158_v23, %v157_v20 }
  0x9c   :  { %v162_v34 = vor.u32 %v161_v24, %v160_v21  ;;  %v167_v35 = vshrl.u32 %v326_v50, %v152_v14  ;;  %v92_v31 = vsel %vm90_vm7, %v91_v27, %v374_v11  ;;  %vm169_vm8 = vcmp.lt.s32.totalorder %v150_v12, 1 }
  0x9d   :  { %v165_v36 = vor.u32 %v164_v28, %v163_v25  ;;  %vm172_vm9 = vcmp.lt.s32.totalorder %v150_v12, 4  ;;  %v93_v37 = vadd.s32 %v92_v31, %v88_v17  ;;  %vm171_vm10 = vcmp.lt.s32.totalorder %v150_v12, 3 }
  0x9e   :  { %v168_v38 = vor.u32 %v167_v35, %v166_v29  ;;  %v174_v39 = vsel %vm172_vm9, %v162_v34, 2102212464  ;;  %v153_v40 = vshrl.u32 %v321_v33, %v152_v14  ;;  %v177_v41 = vsel %vm169_vm8, %v156_v30, %v159_v32 }
  0x9f   :  { %v178_v42 = vsel %vm172_vm9, %v165_v36, 920167782  ;;  %v181_v44 = vsel %vm169_vm8, %v159_v32, %v162_v34  ;;  %v94_v45 = vadd.s32 536870912, %v93_v37  ;;  %vm170_vm11 = vcmp.lt.s32.totalorder %v150_v12, 2 }
  0xa0   :  { %v179_v43 = vsel %vm171_vm10, %v162_v34, %v178_v42  ;;  %v182_v46 = vsel %vm172_vm9, %v168_v38, 1326507024  ;;  %v173_v47 = vsel %vm169_vm8, %v153_v40, %v156_v30  ;;  %v175_v48 = vsel %vm171_vm10, %v159_v32, %v174_v39 }
  0xa1   :  { %v180_v49 = vsel %vm170_vm11, %v177_v41, %v179_v43  ;;  %v183_v50 = vsel %vm171_vm10, %v165_v36, %v182_v46  ;;  %v95_v51 = vshrl.u32 %v94_v45, 30  ;;  %v176_v57 = vsel %vm170_vm11, %v173_v47, %v175_v48 }
  0xa2   :  { %v184_v52 = vsel %vm170_vm11, %v181_v44, %v183_v50  ;;  %v384_v53 = vmul.u32.u64.low %v185_v16, %v180_v49  ;;  %v385_v54 = vmul.u32.u64.high %v185_v16, %v180_v49, %v384_v53  ;;  %v192_v60 = vmul.u32 %v185_v16, %v176_v57 }
  0xa3   :  { %v387_v55 = vmul.u32.u64.low %v185_v16, %v184_v52  ;;  %v388_v56 = vmul.u32.u64.high %v185_v16, %v184_v52, %v387_v55  ;;  %v96_v33 = vshll.u32 %v95_v51, 30  ;;  %v89_v8 = vadd.s32 %v373_v10, %v370_v9 }
  0xa4   :  { %v195_v59 = vadd.s32 1, %v385_v54  ;;  %v119_v35 = vsub.s32 4, %v95_v51  ;;  %vm403_vm2 = vcmp.le.f32.partialorder %v137_v26, 0.7853982  ;;  %vm241_vm6 = vcmask 408576  }
  0xa5   :  { %v97_v58 = vsub.s32 %v93_v37, %v96_v33  ;;  %vm194_vm12 = vc.u32 %v388_v56, %v384_v53  ;;  %v193_v32 = vadd.s32 %v384_v53, %v388_v56  ;;  %vm125_vm7 = vweird.f32 %v346_v13 }
  0xa6   :  { %v196_v62 = vsel %vm194_vm12, %v195_v59, %v385_v54  ;;  %v120_v42 = vsel %vm35_vm15, %v119_v35, %v95_v51  ;;  %vm229_vm11 = vweird.f32 %v350_v19 }
  0xa7   :  { %v99_v61 = vsub.s32 0, %v97_v58  ;;  %v197_v63 = vadd.s32 %v196_v62, %v192_v60  ;;  %v122_v46 = vsel %vm34_vm0, 0, %v120_v42 }
  0xa8   :  { %v126_v49 = vadd.s32 3, %v122_v46 }
  0xa9   :  { %v262_v0 = vmin.u32 %v99_v61, %v97_v58  ;;  %v198_v1 = vadd.s32 536870912, %v197_v63 }
  0xaa   :  { %v127_v53 = vand.u32 3, %v126_v49 }
  0xab   :  { %v101_v2 = vclz %v262_v0  ;;  %v199_v3 = vshrl.u32 %v198_v1, 30 }
  0xac   :  { %vm132_vm3 = vcmp.eq.s32.totalorder %v127_v53, 2  ;;  %vm129_vm4 = vcmp.eq.s32.totalorder %v127_v53, 0  ;;  %vm128_vm5 = vcmp.lt.s32.totalorder %v127_v53, 2 }
  0xad   :  { %v263_v4 = vadd.s32 4294967294, %v101_v2  ;;  %v200_v5 = vshll.u32 %v199_v3, 30  ;;  %v223_v50 = vsub.s32 4, %v199_v3 }
  0xaf   :  { %vm264_vm13 = vcmp.lt.s32.totalorder %v263_v4, 0  ;;  %v201_v7 = vsub.s32 %v197_v63, %v200_v5  ;;  %v224_v54 = vsel %vm139_vm1, %v223_v50, %v199_v3 }
  0xb0   :  { %v104_v6 = vsel %vm264_vm13, 0, %v263_v4  ;;  %v226_v26 = vsel %vm403_vm2, 0, %v224_v54 }
  0xb1   :  { %v105_v11 = vsub.s32 32, %v104_v6  ;;  %v109_v12 = vsub.s32 4294967266, %v104_v6  ;;  %v203_v14 = vsub.s32 0, %v201_v7  ;;  %v106_v16 = vshll.u32 %v97_v58, %v104_v6 }
  0xb2   :  { %v230_v61 = vadd.s32 3, %v226_v26 }
  0xb3   :  { %v107_v17 = vshrl.u32 %v89_v8, %v105_v11  ;;  %v110_v18 = vadd.s32 127, %v109_v12  ;;  %v266_v20 = vmin.u32 %v203_v14, %v201_v7 }
  0xb4   :  { %v231_v63 = vand.u32 3, %v230_v61 }
  0xb5   :  { %v108_v21 = vor.u32 %v107_v17, %v106_v16  ;;  %v111_v22 = vshll.u32 %v110_v18, 23  ;;  %v205_v23 = vclz %v266_v20 }
  0xb6   :  { %vm236_vm8 = vcmp.eq.s32.totalorder %v231_v63, 2  ;;  %vm233_vm9 = vcmp.eq.s32.totalorder %v231_v63, 0  ;;  %vm232_vm10 = vcmp.lt.s32.totalorder %v231_v63, 2 }
  0xb7   :  { %v112_v24 = vor.u32 4788187, %v111_v22  ;;  %v267_v25 = vadd.s32 4294967294, %v205_v23  ;;  %v115_v28 = vcvt.s32.f32 %v108_v21 }
  0xb9   :  { %v113_v27 = vand.u32 2147483647, %v112_v24  ;;  %vm268_vm14 = vcmp.lt.s32.totalorder %v267_v25, 0 }
  0xba   :  { %v208_v30 = vsel %vm268_vm14, 0, %v267_v25 }
  0xbb   :  { %v116_v29 = vmul.f32 %v115_v28, %v113_v27  ;;  %v209_v9 = vsub.s32 32, %v208_v30  ;;  %v213_v10 = vsub.s32 4294967266, %v208_v30  ;;  %v210_v31 = vshll.u32 %v201_v7, %v208_v30 }
  0xbd   :  { %v117_v34 = vxor.u32 2147483648, %v116_v29  ;;  %v211_v36 = vshrl.u32 %v193_v32, %v209_v9  ;;  %v214_v37 = vadd.s32 127, %v213_v10 }
  0xbf   :  { %v118_v38 = vsel %vm35_vm15, %v117_v34, %v116_v29  ;;  %v212_v40 = vor.u32 %v211_v36, %v210_v31  ;;  %v215_v41 = vshll.u32 %v214_v37, 23 }
  0xc0   :  { %v121_v39 = vsel %vm34_vm0, %v346_v13, %v118_v38 }
  0xc1   :  { %289 = vcosq.f32 %v121_v39  ;;  %v216_v44 = vor.u32 4788187, %v215_v41  ;;  %v219_v43 = vcvt.s32.f32 %v212_v40 }
  0xc2   :  { %291 = vsinq.f32 %v121_v39 }
  0xc3   :  { %v217_v45 = vand.u32 2147483647, %v216_v44 }
  0xc5   :  { %v220_v47 = vmul.f32 %v219_v43, %v217_v45 }
  0xc7   :  { %v221_v48 = vxor.u32 2147483648, %v220_v47 }
  0xc9   :  { %v222_v52 = vsel %vm139_vm1, %v221_v48, %v220_v47 }
  0xca   :  { %v225_v51 = vsel %vm403_vm2, %v350_v19, %v222_v52 }
  0xcb   :  { %293 = vcosq.f32 %v225_v51 }
  0xcc   :  { %295 = vsinq.f32 %v225_v51 }
  0xce   :  { %v290_v55 = vpop.eup %289 }
  0xcf   :  { %v292_v56 = vpop.eup %291  ;;  %v133_v33 = vxor.u32 2147483648, %v290_v55 }
  0xd0   :  { %v130_v57 = vxor.u32 2147483648, %v292_v56 }
  0xd1   :  { %v134_v58 = vsel %vm132_vm3, %v133_v33, %v292_v56 }
  0xd2   :  { %v131_v59 = vsel %vm129_vm4, %v290_v55, %v130_v57 }
  0xd3   :  { %v135_v60 = vsel %vm128_vm5, %v131_v59, %v134_v58 }
  0xd4   :  { %v136_v62 = vsel %vm125_vm7, nan, %v135_v60 }
  0xd5   :  { %242 = vst.msk [vmem:[#allocation2] sm:$0xff] %vm241_vm6, %v136_v62 }
  0xd8   :  { %v294_v0 = vpop.eup %293 }
  0xd9   :  { %v296_v1 = vpop.eup %295  ;;  %v237_v2 = vxor.u32 2147483648, %v294_v0 }
  0xda   :  { %v234_v3 = vxor.u32 2147483648, %v296_v1 }
  0xdb   :  { %v238_v4 = vsel %vm236_vm8, %v237_v2, %v296_v1 }
  0xdc   :  { %v235_v5 = vsel %vm233_vm9, %v294_v0, %v234_v3 }
  0xdd   :  { %v239_v13 = vsel %vm232_vm10, %v235_v5, %v238_v4 }
  0xde   :  { %v240_v6 = vsel %vm229_vm11, nan, %v239_v13 }
  0xdf   :  { %243 = vst.msk [vmem:[#allocation2 + $0x8] sm:$0xff] %vm241_vm6, %v240_v6 }
  0xe0   :  { %308 = shalt.err (!%p305_p4)
}
  0xe1   :  { %s328_s12 = smov 128   ;;  %s329_s13 = smov 8  }
  0xe2   :  { %255 = dma.vmem_to_hbm [thread:$0]  %s250_s10, 256, %s420_s1, [#allocation3], %s328_s12, %s328_s12, %s329_s13  }
  0xe3   :  { %317 = dma.done.wait [#allocation3], 256  }
  0xe4   :  { %318 = vsyncadd [#allocation3], 4294967040 }
  0xe5   :  { %259 = vsyncpa [#allocation3], 1 }

</bundles_post_ra>
